<compile_context>
chip_gen: v5e
topology: v5e:2x2
jax: 0.10.0
libtpu: 0.0.40
codegen_flags: <defaults>
</compile_context>

<pallas_src>
import functools

import jax
import jax.numpy as jnp
from jax.experimental import pallas as pl
from jax.experimental.pallas import tpu as pltpu


def _round_up(a, m):
    return (a + m - 1) // m * m


def _repnet_kernel(x_ref, w1_ref, b1_ref, w2_ref, b2_ref, g_ref, bt_ref, o_ref,
                   *, eps, k_real):
    # x_ref : (TILE_N, V)       input dtype (cast to bf16 for the MXU)
    # w1_ref: (V, D_pad)  bf16     b1_ref: (1, D_pad) f32
    # w2_ref: (D_pad, K_pad) bf16  b2_ref: (1, K_pad) f32
    # g_ref : (1, K_pad) f32       bt_ref: (1, K_pad) f32
    # o_ref : (TILE_N, K_pad) f32
    x = x_ref[...].astype(jnp.bfloat16)

    # proj: (TILE_N, V) @ (V, D_pad) -> f32 accumulate on the MXU.
    h = jnp.dot(x, w1_ref[...], preferred_element_type=jnp.float32) + b1_ref[...]

    # linear: (TILE_N, D_pad) @ (D_pad, K_pad) -> f32 accumulate on the MXU.
    s = jnp.dot(h.astype(jnp.bfloat16), w2_ref[...],
                preferred_element_type=jnp.float32) + b2_ref[...]

    # LayerNorm over the real (unpadded) state_dim columns, all in f32.
    # Padded columns of s are exactly zero (zero-padded W/b), so the row sum
    # only needs the real-K divisor; centered values are masked before the
    # variance so padded lanes do not contribute (-mean)^2.
    k_pad = s.shape[-1]
    inv_k = 1.0 / float(k_real)
    mean = jnp.sum(s, axis=-1, keepdims=True) * inv_k
    c = s - mean
    if k_pad != k_real:
        col = jax.lax.broadcasted_iota(jnp.int32, s.shape, 1)
        c = jnp.where(col < k_real, c, 0.0)
    var = jnp.sum(c * c, axis=-1, keepdims=True) * inv_k
    inv = jax.lax.rsqrt(var + eps)                      # EUP rsqrt
    o_ref[...] = (c * inv * g_ref[...] + bt_ref[...]).astype(o_ref.dtype)


def representation_network_forward(x, w_proj, b_proj, w_lin, b_lin, gamma, beta,
                                   *, eps=1e-5, tile_n=512):
    """x: (B, S, V); weights stored pre-transposed: w_proj (V, D), w_lin (D, K).

    Returns (B, S, K) f32 with the same semantics as the PyTorch module.
    """
    b, s_len, v = x.shape
    d = w_proj.shape[1]
    k = w_lin.shape[1]
    n = b * s_len

    d_pad = _round_up(d, 128)
    k_pad = _round_up(k, 128)

    # One-time (tiny) weight prep: zero-pad to lane-dense shapes, bf16 for MXU.
    w1 = jnp.pad(w_proj, ((0, 0), (0, d_pad - d))).astype(jnp.bfloat16)
    w2 = jnp.pad(w_lin, ((0, d_pad - d), (0, k_pad - k))).astype(jnp.bfloat16)
    b1 = jnp.pad(b_proj, (0, d_pad - d)).reshape(1, d_pad).astype(jnp.float32)
    b2 = jnp.pad(b_lin, (0, k_pad - k)).reshape(1, k_pad).astype(jnp.float32)
    g = jnp.pad(gamma, (0, k_pad - k)).reshape(1, k_pad).astype(jnp.float32)
    bt = jnp.pad(beta, (0, k_pad - k)).reshape(1, k_pad).astype(jnp.float32)

    # Keep x in its source dtype (no extra full-HBM astype pass); the kernel
    # casts the tile to bf16 for the MXU.
    x2 = x.reshape(n, v)
    x_item = jnp.dtype(x2.dtype).itemsize

    # ---- tile_n selection against an explicit VMEM budget --------------------
    weight_bytes = (v * d_pad + d_pad * k_pad) * 2 + (d_pad + 3 * k_pad) * 4
    bytes_per_row = (2 * v * x_item          # x tile, double buffered
                     + 2 * k_pad * 4         # out tile, double buffered (f32)
                     + (d_pad + k_pad) * 4)  # h / s intermediates (f32)
    vmem_budget = 24 << 20                   # headroom under the 32 MiB limit
    rows_cap = max(8, ((vmem_budget - weight_bytes) // bytes_per_row) // 8 * 8)

    n_up8 = _round_up(max(n, 1), 8)
    # Cap so the grid has >= 2 steps whenever N allows (v7x megacore).
    half = max(8, _round_up(-(-n_up8 // 2), 8))
    tile_n = max(8, min(int(tile_n), rows_cap, half) // 8 * 8)

    n_pad = pl.cdiv(n, tile_n) * tile_n
    if n_pad != n:
        x2 = jnp.pad(x2, ((0, n_pad - n), (0, 0)))   # only when strictly needed
    grid = (n_pad // tile_n,)

    cost = pl.CostEstimate(
        flops=2 * n_pad * (v * d_pad + d_pad * k_pad),
        transcendentals=n_pad,  # one rsqrt per token row
        bytes_accessed=n_pad * v * x_item + n_pad * k_pad * 4 + weight_bytes,
    )

    def _build(single_buffer_weights):
        def wspec(shape):
            kwargs = {}
            if single_buffer_weights:
                kwargs["pipeline_mode"] = pl.Buffered(1)
            return pl.BlockSpec(shape, lambda i: (0,) * len(shape), **kwargs)

        return pl.pallas_call(
            functools.partial(_repnet_kernel, eps=float(eps), k_real=int(k)),
            out_shape=jax.ShapeDtypeStruct((n_pad, k_pad), jnp.float32),
            grid=grid,
            in_specs=[
                pl.BlockSpec((tile_n, v), lambda i: (i, 0)),   # x tile (pipelined)
                wspec((v, d_pad)),                             # W_proj (resident)
                wspec((1, d_pad)),                             # b_proj
                wspec((d_pad, k_pad)),                         # W_linear (resident)
                wspec((1, k_pad)),                             # b_linear
                wspec((1, k_pad)),                             # gamma
                wspec((1, k_pad)),                             # beta
            ],
            out_specs=pl.BlockSpec((tile_n, k_pad), lambda i: (i, 0)),
            compiler_params=pltpu.CompilerParams(
                dimension_semantics=("parallel",),
                vmem_limit_bytes=32 << 20,
            ),
            cost_estimate=cost,
        )

    args = (x2, w1, b1, w2, b2, g, bt)
    if hasattr(pl, "Buffered"):
        try:
            out = _build(True)(*args)
        except Exception:
            out = _build(False)(*args)
    else:
        out = _build(False)(*args)

    return out[:n, :k].reshape(b, s_len, k)


def _reference(x, w_proj, b_proj, w_lin, b_lin, gamma, beta, eps=1e-5):
    h = jnp.einsum("bsv,vd->bsd", x, w_proj) + b_proj
    s = jnp.einsum("bsd,dk->bsk", h, w_lin) + b_lin
    mean = jnp.mean(s, axis=-1, keepdims=True)
    var = jnp.mean((s - mean) ** 2, axis=-1, keepdims=True)
    return (s - mean) * jax.lax.rsqrt(var + eps) * gamma + beta


if __name__ == "__main__":
    # Small deterministic setup consistent with the module's forward.
    batch_size, seq_len = 2, 8
    vocab_dim, d_model, state_dim = 32, 32, 32

    key = jax.random.PRNGKey(0)
    kx, kw1, kb1, kw2, kb2 = jax.random.split(key, 5)

    x = jax.random.normal(kx, (batch_size, seq_len, vocab_dim), dtype=jnp.float32)

    # Weights stored pre-transposed ((in, out)) so the kernel does x @ W directly.
    w_proj = jax.random.normal(kw1, (vocab_dim, d_model), dtype=jnp.float32) * 0.1
    b_proj = jax.random.normal(kb1, (d_model,), dtype=jnp.float32) * 0.1
    w_lin = jax.random.normal(kw2, (d_model, state_dim), dtype=jnp.float32) * 0.1
    b_lin = jax.random.normal(kb2, (state_dim,), dtype=jnp.float32) * 0.1
    # nn.LayerNorm default affine params.
    gamma = jnp.ones((state_dim,), dtype=jnp.float32)
    beta = jnp.zeros((state_dim,), dtype=jnp.float32)

    out = representation_network_forward(x, w_proj, b_proj, w_lin, b_lin, gamma, beta)
    out = jax.block_until_ready(out)

    ref = _reference(x, w_proj, b_proj, w_lin, b_lin, gamma, beta)
    assert out.shape == (batch_size, seq_len, state_dim)
    # bf16 MXU operands -> looser tolerance than a pure-f32 comparison.
    max_err = float(jnp.max(jnp.abs(out - ref)))
    assert max_err < 5e-2, f"mismatch vs reference (max abs err = {max_err})"

    print("KERNEL_OK")
</pallas_src>

<mosaic_0001>
module attributes {stable_mosaic.version = 11 : i64} {
  func.func @_repnet_kernel(%arg0: i32, %arg1: memref<8x32xf32, #tpu.memory_space<vmem>>, %arg2: memref<32x128xbf16, #tpu.memory_space<vmem>>, %arg3: memref<1x128xf32, #tpu.memory_space<vmem>>, %arg4: memref<128x128xbf16, #tpu.memory_space<vmem>>, %arg5: memref<1x128xf32, #tpu.memory_space<vmem>>, %arg6: memref<1x128xf32, #tpu.memory_space<vmem>>, %arg7: memref<1x128xf32, #tpu.memory_space<vmem>>, %arg8: memref<8x128xf32, #tpu.memory_space<vmem>>) attributes {dimension_semantics = [#tpu.dimension_semantics<parallel>], iteration_bounds = array<i64: 2>, scalar_prefetch = 0 : i64, scratch_operands = 0 : i64, tpu.core_type = #tpu.core_type<tc>, window_params = [{transform_indices = @transform_0, window_bounds = array<i64: 8, 32>}, {pipeline_mode = #tpu.pipeline_mode<synchronous>, transform_indices = @transform_1, window_bounds = array<i64: 32, 128>}, {pipeline_mode = #tpu.pipeline_mode<synchronous>, transform_indices = @transform_2, window_bounds = array<i64: 1, 128>}, {pipeline_mode = #tpu.pipeline_mode<synchronous>, transform_indices = @transform_3, window_bounds = array<i64: 128, 128>}, {pipeline_mode = #tpu.pipeline_mode<synchronous>, transform_indices = @transform_4, window_bounds = array<i64: 1, 128>}, {pipeline_mode = #tpu.pipeline_mode<synchronous>, transform_indices = @transform_5, window_bounds = array<i64: 1, 128>}, {pipeline_mode = #tpu.pipeline_mode<synchronous>, transform_indices = @transform_6, window_bounds = array<i64: 1, 128>}, {transform_indices = @transform_7, window_bounds = array<i64: 8, 128>}]} {
    %c0 = arith.constant 0 : index
    %c0_0 = arith.constant 0 : index
    %0 = vector.load %arg1[%c0, %c0_0] : memref<8x32xf32, #tpu.memory_space<vmem>>, vector<8x32xf32>
    %1 = arith.truncf %0 : vector<8x32xf32> to vector<8x32xbf16>
    %c0_1 = arith.constant 0 : index
    %c0_2 = arith.constant 0 : index
    %2 = vector.load %arg2[%c0_1, %c0_2] : memref<32x128xbf16, #tpu.memory_space<vmem>>, vector<32x128xbf16>
    %cst = arith.constant dense<0.000000e+00> : vector<8x128xf32>
    %3 = tpu.matmul %1, %2, %cst {dimension_numbers = #tpu.dot_dimension_numbers<[1], [0], [0], [1], [0, 0, 1, 1], [], []>} : vector<8x32xbf16>, vector<32x128xbf16>, vector<8x128xf32> -> vector<8x128xf32>
    %c0_3 = arith.constant 0 : index
    %c0_4 = arith.constant 0 : index
    %4 = vector.load %arg3[%c0_3, %c0_4] : memref<1x128xf32, #tpu.memory_space<vmem>>, vector<1x128xf32>
    %5 = vector.broadcast %4 : vector<1x128xf32> to vector<8x128xf32>
    %6 = arith.addf %3, %5 : vector<8x128xf32>
    %7 = arith.truncf %6 : vector<8x128xf32> to vector<8x128xbf16>
    %c0_5 = arith.constant 0 : index
    %c0_6 = arith.constant 0 : index
    %8 = vector.load %arg4[%c0_5, %c0_6] : memref<128x128xbf16, #tpu.memory_space<vmem>>, vector<128x128xbf16>
    %cst_7 = arith.constant dense<0.000000e+00> : vector<8x128xf32>
    %9 = tpu.matmul %7, %8, %cst_7 {dimension_numbers = #tpu.dot_dimension_numbers<[1], [0], [0], [1], [0, 0, 1, 1], [], []>} : vector<8x128xbf16>, vector<128x128xbf16>, vector<8x128xf32> -> vector<8x128xf32>
    %c0_8 = arith.constant 0 : index
    %c0_9 = arith.constant 0 : index
    %10 = vector.load %arg5[%c0_8, %c0_9] : memref<1x128xf32, #tpu.memory_space<vmem>>, vector<1x128xf32>
    %11 = vector.broadcast %10 : vector<1x128xf32> to vector<8x128xf32>
    %12 = arith.addf %9, %11 : vector<8x128xf32>
    %cst_10 = arith.constant dense<0.000000e+00> : vector<8xf32>
    %13 = vector.multi_reduction <add>, %12, %cst_10 [1] : vector<8x128xf32> to vector<8xf32>
    %14 = vector.shape_cast %13 : vector<8xf32> to vector<8x1xf32>
    %cst_11 = arith.constant 3.125000e-02 : f32
    %15 = vector.broadcast %cst_11 : f32 to vector<8x1xf32>
    %16 = arith.mulf %14, %15 : vector<8x1xf32>
    %17 = vector.broadcast %16 : vector<8x1xf32> to vector<8x128xf32>
    %18 = arith.subf %12, %17 : vector<8x128xf32>
    %19 = tpu.iota {dimensions = array<i32: 1>} : vector<8x128xi32>
    %c32_i32 = arith.constant 32 : i32
    %20 = vector.broadcast %c32_i32 : i32 to vector<8x128xi32>
    %21 = arith.cmpi slt, %19, %20 : vector<8x128xi32>
    %cst_12 = arith.constant 0.000000e+00 : f32
    %22 = vector.broadcast %cst_12 : f32 to vector<8x128xf32>
    %23 = arith.select %21, %18, %22 : vector<8x128xi1>, vector<8x128xf32>
    %24 = arith.mulf %23, %23 : vector<8x128xf32>
    %cst_13 = arith.constant dense<0.000000e+00> : vector<8xf32>
    %25 = vector.multi_reduction <add>, %24, %cst_13 [1] : vector<8x128xf32> to vector<8xf32>
    %26 = vector.shape_cast %25 : vector<8xf32> to vector<8x1xf32>
    %cst_14 = arith.constant 3.125000e-02 : f32
    %27 = vector.broadcast %cst_14 : f32 to vector<8x1xf32>
    %28 = arith.mulf %26, %27 : vector<8x1xf32>
    %cst_15 = arith.constant 9.99999974E-6 : f32
    %29 = vector.broadcast %cst_15 : f32 to vector<8x1xf32>
    %30 = arith.addf %28, %29 : vector<8x1xf32>
    %31 = math.rsqrt %30 : vector<8x1xf32>
    %32 = vector.broadcast %31 : vector<8x1xf32> to vector<8x128xf32>
    %33 = arith.mulf %23, %32 : vector<8x128xf32>
    %c0_16 = arith.constant 0 : index
    %c0_17 = arith.constant 0 : index
    %34 = vector.load %arg6[%c0_16, %c0_17] : memref<1x128xf32, #tpu.memory_space<vmem>>, vector<1x128xf32>
    %35 = vector.broadcast %34 : vector<1x128xf32> to vector<8x128xf32>
    %36 = arith.mulf %33, %35 : vector<8x128xf32>
    %c0_18 = arith.constant 0 : index
    %c0_19 = arith.constant 0 : index
    %37 = vector.load %arg7[%c0_18, %c0_19] : memref<1x128xf32, #tpu.memory_space<vmem>>, vector<1x128xf32>
    %38 = vector.broadcast %37 : vector<1x128xf32> to vector<8x128xf32>
    %39 = arith.addf %36, %38 : vector<8x128xf32>
    %c0_20 = arith.constant 0 : index
    %c0_21 = arith.constant 0 : index
    %40 = vector.load %arg8[%c0_20, %c0_21] : memref<8x128xf32, #tpu.memory_space<vmem>>, vector<8x128xf32>
    tpu.vector_store %arg8[%c0_20, %c0_21], %39 {strides = array<i32>} : memref<8x128xf32, #tpu.memory_space<vmem>>, vector<8x128xf32>,
    return
  }
  func.func @transform_0(%arg0: i32) -> (i32, i32) {
    %c0_i32 = arith.constant 0 : i32
    %c0_i32_0 = arith.constant 0 : i32
    return %arg0, %c0_i32 : i32, i32
  }
  func.func @transform_1(%arg0: i32) -> (i32, i32) {
    %c0_i32 = arith.constant 0 : i32
    %c0_i32_0 = arith.constant 0 : i32
    %c0_i32_1 = arith.constant 0 : i32
    return %c0_i32, %c0_i32_0 : i32, i32
  }
  func.func @transform_2(%arg0: i32) -> (i32, i32) {
    %c0_i32 = arith.constant 0 : i32
    %c0_i32_0 = arith.constant 0 : i32
    %c0_i32_1 = arith.constant 0 : i32
    return %c0_i32, %c0_i32_0 : i32, i32
  }
  func.func @transform_3(%arg0: i32) -> (i32, i32) {
    %c0_i32 = arith.constant 0 : i32
    %c0_i32_0 = arith.constant 0 : i32
    %c0_i32_1 = arith.constant 0 : i32
    return %c0_i32, %c0_i32_0 : i32, i32
  }
  func.func @transform_4(%arg0: i32) -> (i32, i32) {
    %c0_i32 = arith.constant 0 : i32
    %c0_i32_0 = arith.constant 0 : i32
    %c0_i32_1 = arith.constant 0 : i32
    return %c0_i32, %c0_i32_0 : i32, i32
  }
  func.func @transform_5(%arg0: i32) -> (i32, i32) {
    %c0_i32 = arith.constant 0 : i32
    %c0_i32_0 = arith.constant 0 : i32
    %c0_i32_1 = arith.constant 0 : i32
    return %c0_i32, %c0_i32_0 : i32, i32
  }
  func.func @transform_6(%arg0: i32) -> (i32, i32) {
    %c0_i32 = arith.constant 0 : i32
    %c0_i32_0 = arith.constant 0 : i32
    %c0_i32_1 = arith.constant 0 : i32
    return %c0_i32, %c0_i32_0 : i32, i32
  }
  func.func @transform_7(%arg0: i32) -> (i32, i32) {
    %c0_i32 = arith.constant 0 : i32
    %c0_i32_0 = arith.constant 0 : i32
    return %arg0, %c0_i32 : i32, i32
  }
}

module attributes {stable_mosaic.version = 11 : i64} {
  func.func @_repnet_kernel(%arg0: i32, %arg1: memref<8x32xf32, #tpu.memory_space<vmem>>, %arg2: memref<32x128xbf16, #tpu.memory_space<vmem>>, %arg3: memref<1x128xf32, #tpu.memory_space<vmem>>, %arg4: memref<128x128xbf16, #tpu.memory_space<vmem>>, %arg5: memref<1x128xf32, #tpu.memory_space<vmem>>, %arg6: memref<1x128xf32, #tpu.memory_space<vmem>>, %arg7: memref<1x128xf32, #tpu.memory_space<vmem>>, %arg8: memref<8x128xf32, #tpu.memory_space<vmem>>) attributes {dimension_semantics = [#tpu.dimension_semantics<parallel>], iteration_bounds = array<i64: 2>, scalar_prefetch = 0 : i64, scratch_operands = 0 : i64, tpu.core_type = #tpu.core_type<tc>, window_params = [{transform_indices = @transform_0, window_bounds = array<i64: 8, 32>}, {pipeline_mode = #tpu.pipeline_mode<synchronous>, transform_indices = @transform_1, window_bounds = array<i64: 32, 128>}, {pipeline_mode = #tpu.pipeline_mode<synchronous>, transform_indices = @transform_2, window_bounds = array<i64: 1, 128>}, {pipeline_mode = #tpu.pipeline_mode<synchronous>, transform_indices = @transform_3, window_bounds = array<i64: 128, 128>}, {pipeline_mode = #tpu.pipeline_mode<synchronous>, transform_indices = @transform_4, window_bounds = array<i64: 1, 128>}, {pipeline_mode = #tpu.pipeline_mode<synchronous>, transform_indices = @transform_5, window_bounds = array<i64: 1, 128>}, {pipeline_mode = #tpu.pipeline_mode<synchronous>, transform_indices = @transform_6, window_bounds = array<i64: 1, 128>}, {transform_indices = @transform_7, window_bounds = array<i64: 8, 128>}]} {
    %c0 = arith.constant 0 : index
    %c0_0 = arith.constant 0 : index
    %0 = vector.load %arg1[%c0, %c0_0] : memref<8x32xf32, #tpu.memory_space<vmem>>, vector<8x32xf32>
    %1 = arith.truncf %0 : vector<8x32xf32> to vector<8x32xbf16>
    %c0_1 = arith.constant 0 : index
    %c0_2 = arith.constant 0 : index
    %2 = vector.load %arg2[%c0_1, %c0_2] : memref<32x128xbf16, #tpu.memory_space<vmem>>, vector<32x128xbf16>
    %cst = arith.constant dense<0.000000e+00> : vector<8x128xf32>
    %3 = tpu.matmul %1, %2, %cst {dimension_numbers = #tpu.dot_dimension_numbers<[1], [0], [0], [1], [0, 0, 1, 1], [], []>} : vector<8x32xbf16>, vector<32x128xbf16>, vector<8x128xf32> -> vector<8x128xf32>
    %c0_3 = arith.constant 0 : index
    %c0_4 = arith.constant 0 : index
    %4 = vector.load %arg3[%c0_3, %c0_4] : memref<1x128xf32, #tpu.memory_space<vmem>>, vector<1x128xf32>
    %5 = vector.broadcast %4 : vector<1x128xf32> to vector<8x128xf32>
    %6 = arith.addf %3, %5 : vector<8x128xf32>
    %7 = arith.truncf %6 : vector<8x128xf32> to vector<8x128xbf16>
    %c0_5 = arith.constant 0 : index
    %c0_6 = arith.constant 0 : index
    %8 = vector.load %arg4[%c0_5, %c0_6] : memref<128x128xbf16, #tpu.memory_space<vmem>>, vector<128x128xbf16>
    %cst_7 = arith.constant dense<0.000000e+00> : vector<8x128xf32>
    %9 = tpu.matmul %7, %8, %cst_7 {dimension_numbers = #tpu.dot_dimension_numbers<[1], [0], [0], [1], [0, 0, 1, 1], [], []>} : vector<8x128xbf16>, vector<128x128xbf16>, vector<8x128xf32> -> vector<8x128xf32>
    %c0_8 = arith.constant 0 : index
    %c0_9 = arith.constant 0 : index
    %10 = vector.load %arg5[%c0_8, %c0_9] : memref<1x128xf32, #tpu.memory_space<vmem>>, vector<1x128xf32>
    %11 = vector.broadcast %10 : vector<1x128xf32> to vector<8x128xf32>
    %12 = arith.addf %9, %11 : vector<8x128xf32>
    %cst_10 = arith.constant dense<0.000000e+00> : vector<8xf32>
    %13 = vector.multi_reduction <add>, %12, %cst_10 [1] : vector<8x128xf32> to vector<8xf32>
    %14 = vector.shape_cast %13 : vector<8xf32> to vector<8x1xf32>
    %cst_11 = arith.constant 3.125000e-02 : f32
    %15 = vector.broadcast %cst_11 : f32 to vector<8x1xf32>
    %16 = arith.mulf %14, %15 : vector<8x1xf32>
    %17 = vector.broadcast %16 : vector<8x1xf32> to vector<8x128xf32>
    %18 = arith.subf %12, %17 : vector<8x128xf32>
    %19 = tpu.iota {dimensions = array<i32: 1>} : vector<8x128xi32>
    %c32_i32 = arith.constant 32 : i32
    %20 = vector.broadcast %c32_i32 : i32 to vector<8x128xi32>
    %21 = arith.cmpi slt, %19, %20 : vector<8x128xi32>
    %cst_12 = arith.constant 0.000000e+00 : f32
    %22 = vector.broadcast %cst_12 : f32 to vector<8x128xf32>
    %23 = arith.select %21, %18, %22 : vector<8x128xi1>, vector<8x128xf32>
    %24 = arith.mulf %23, %23 : vector<8x128xf32>
    %cst_13 = arith.constant dense<0.000000e+00> : vector<8xf32>
    %25 = vector.multi_reduction <add>, %24, %cst_13 [1] : vector<8x128xf32> to vector<8xf32>
    %26 = vector.shape_cast %25 : vector<8xf32> to vector<8x1xf32>
    %cst_14 = arith.constant 3.125000e-02 : f32
    %27 = vector.broadcast %cst_14 : f32 to vector<8x1xf32>
    %28 = arith.mulf %26, %27 : vector<8x1xf32>
    %cst_15 = arith.constant 9.99999974E-6 : f32
    %29 = vector.broadcast %cst_15 : f32 to vector<8x1xf32>
    %30 = arith.addf %28, %29 : vector<8x1xf32>
    %31 = math.rsqrt %30 : vector<8x1xf32>
    %32 = vector.broadcast %31 : vector<8x1xf32> to vector<8x128xf32>
    %33 = arith.mulf %23, %32 : vector<8x128xf32>
    %c0_16 = arith.constant 0 : index
    %c0_17 = arith.constant 0 : index
    %34 = vector.load %arg6[%c0_16, %c0_17] : memref<1x128xf32, #tpu.memory_space<vmem>>, vector<1x128xf32>
    %35 = vector.broadcast %34 : vector<1x128xf32> to vector<8x128xf32>
    %36 = arith.mulf %33, %35 : vector<8x128xf32>
    %c0_18 = arith.constant 0 : index
    %c0_19 = arith.constant 0 : index
    %37 = vector.load %arg7[%c0_18, %c0_19] : memref<1x128xf32, #tpu.memory_space<vmem>>, vector<1x128xf32>
    %38 = vector.broadcast %37 : vector<1x128xf32> to vector<8x128xf32>
    %39 = arith.addf %36, %38 : vector<8x128xf32>
    %c0_20 = arith.constant 0 : index
    %c0_21 = arith.constant 0 : index
    %40 = vector.load %arg8[%c0_20, %c0_21] : memref<8x128xf32, #tpu.memory_space<vmem>>, vector<8x128xf32>
    tpu.vector_store %arg8[%c0_20, %c0_21], %39 {strides = array<i32>} : memref<8x128xf32, #tpu.memory_space<vmem>>, vector<8x128xf32>,
    return
  }
  func.func @transform_0(%arg0: i32) -> (i32, i32) {
    %c0_i32 = arith.constant 0 : i32
    %c0_i32_0 = arith.constant 0 : i32
    return %arg0, %c0_i32 : i32, i32
  }
  func.func @transform_1(%arg0: i32) -> (i32, i32) {
    %c0_i32 = arith.constant 0 : i32
    %c0_i32_0 = arith.constant 0 : i32
    %c0_i32_1 = arith.constant 0 : i32
    return %c0_i32, %c0_i32_0 : i32, i32
  }
  func.func @transform_2(%arg0: i32) -> (i32, i32) {
    %c0_i32 = arith.constant 0 : i32
    %c0_i32_0 = arith.constant 0 : i32
    %c0_i32_1 = arith.constant 0 : i32
    return %c0_i32, %c0_i32_0 : i32, i32
  }
  func.func @transform_3(%arg0: i32) -> (i32, i32) {
    %c0_i32 = arith.constant 0 : i32
    %c0_i32_0 = arith.constant 0 : i32
    %c0_i32_1 = arith.constant 0 : i32
    return %c0_i32, %c0_i32_0 : i32, i32
  }
  func.func @transform_4(%arg0: i32) -> (i32, i32) {
    %c0_i32 = arith.constant 0 : i32
    %c0_i32_0 = arith.constant 0 : i32
    %c0_i32_1 = arith.constant 0 : i32
    return %c0_i32, %c0_i32_0 : i32, i32
  }
  func.func @transform_5(%arg0: i32) -> (i32, i32) {
    %c0_i32 = arith.constant 0 : i32
    %c0_i32_0 = arith.constant 0 : i32
    %c0_i32_1 = arith.constant 0 : i32
    return %c0_i32, %c0_i32_0 : i32, i32
  }
  func.func @transform_6(%arg0: i32) -> (i32, i32) {
    %c0_i32 = arith.constant 0 : i32
    %c0_i32_0 = arith.constant 0 : i32
    %c0_i32_1 = arith.constant 0 : i32
    return %c0_i32, %c0_i32_0 : i32, i32
  }
  func.func @transform_7(%arg0: i32) -> (i32, i32) {
    %c0_i32 = arith.constant 0 : i32
    %c0_i32_0 = arith.constant 0 : i32
    return %arg0, %c0_i32 : i32, i32
  }
}

</mosaic_0001>

<bundles_post_ra>
// kernel: tpu_custom_call.1
= control target key start
LH: loop header
LB: loop body
LE: loop exit
PB: predicated region body
PF: predicated region fallthrough
CT: control target
= control target key end

     0   :  { %s1100_s0 = inlined_call_operand.hbm [shape: f32[16,32], index: 0, kind: input, shape index: {}]   ;;  %s1101_s1 = inlined_call_operand.hbm [shape: bf16[32,128], index: 1, kind: input, shape index: {}]   ;;  %s1102_s2 = inlined_call_operand.vmem [shape: f32[1,128], index: 2, kind: input, shape index: {}]   ;;  %s1103_s3 = inlined_call_operand.hbm [shape: bf16[128,128], index: 3, kind: input, shape index: {}]   ;;  %s1104_s4 = inlined_call_operand.vmem [shape: f32[1,128], index: 4, kind: input, shape index: {}]   ;;  %s1105_s5 = inlined_call_operand.vmem [shape: f32[1,128], index: 5, kind: input, shape index: {}]   ;;  %s1106_s6 = inlined_call_operand.vmem [shape: f32[1,128], index: 6, kind: input, shape index: {}]   ;;  %s1107_s7 = inlined_call_operand.hbm [shape: f32[16,128], index: 7, kind: output, shape index: {}]  }
   0x1   :  { %1108 = sst [smem:[#allocation12_spill]] %s1101_s1 }
   0x2   :  { %1109 = sst [smem:[#allocation13_spill]] %s1103_s3 }
   0x3   :  { %12 = vsyncpa [#allocation3], 0 }
   0x4   :  { %14 = vsyncpa [#allocation3 + $0x1], 0 }
   0x5   :  { %15 = vsyncpa [#allocation6], 0 }
   0x6   :  { %16 = vsyncpa [#allocation4], 0 }
   0x7   :  { %18 = vsyncpa [#allocation4 + $0x1], 0  ;;  %s939_s24 = smov 0   ;;  %s941_s25 = smov 0  }
   0x8   :  { %s943_s26 = smov 0   ;;  %s945_s27 = smov 0  }
   0x9 LB: > { %s1110_s1 = sld [smem:[#allocation12_spill]]  ;;  %s963_s8 = sadd.s32 4294967295, %s893_s27   ;;  %s893_s27 = sphi %s945_s27, %s1122_s27   ;;  %s889_s26 = sphi %s943_s26, %s1121_s26   ;;  %s885_s25 = sphi %s941_s25, %s1120_s25   ;;  %s881_s24 = sphi %s939_s24, %s1119_s24  }
   0xa   : > { %p592_p0 = scmp.ge.s32.totalorder %s893_s27, 1  ;;  %p45_p1 = scmp.eq.s32.totalorder %s963_s8, 0 }
   0xb   : > { %p207_p2 = scmp.lt.s32.totalorder %s893_s27, 3  ;;  %s895_s10 = smov [#allocation5]  }
   0xc   : > { %s220_s11 = sshll.u32 %s895_s10, 4  ;;  %s1112_s3 = sld [smem:[#allocation13_spill]]  ;;  %s221_s11 = int_to_ptr.vmem [resolvable:$true] %s220_s11 }
   0xd   : > { %p968_p3 = pnand %p592_p0, %p207_p2  ;;  %s896_s15 = smov [#allocation7]  }
   0xe   : > { %s237_s16 = sshll.u32 %s896_s15, 4  ;;  %s897_s17 = smov 64   ;;  %s238_s16 = int_to_ptr.vmem [resolvable:$true] %s237_s16 }
   0xf   : > { %s218_s30 = sshll.u32 %s1110_s1, 4  ;;  %p670_p4 = pneg %p968_p3  ;;  %s219_s30 = int_to_ptr.hbm [resolvable:$true] %s218_s30 }
  0x10   : > { %s898_s18 = smov 4   ;;  %s591_s19 = sadd.s32 4294967294, %s893_s27  }
  0x11   : > { %p671_p6 = pnand %p670_p4, %p45_p1  ;;  %s982_s20 = sadd.s32 1, %s893_s27  }
  0x12   : > { %s235_s14 = sshll.u32 %s1112_s3, 4  ;;  %s28_s21 = ssub.s32 %s893_s27, %s982_s20  ;;  %s236_s14 = int_to_ptr.hbm [resolvable:$true] %s235_s14 }
  0x13   : > { %673 = dma.hbm_to_vmem [thread:$0]  (!%p671_p6), %s219_s30, 256, %s221_s11, [#allocation6], %s897_s17, %s897_s17, %s898_s18  }
  0x14   : > { %676 = dma.hbm_to_vmem [thread:$0]  (!%p671_p6), %s236_s14, 1024, %s238_s16, [#allocation6], %s897_s17, %s897_s17, %s898_s18  }
  0x15   : > { %s31_s22 = sadd.s32 1, %s889_s26  ;;  %p29_p7 = scmp.eq.s32.totalorder %s28_s21, 0 }
  0x16   : > { %p38_p8 = scmp.ne.s32.totalorder %s889_s26, %s885_s25  ;;  %p39_p9 = scmp.eq.s32.totalorder %s893_s27, 0 }
  0x17   : > { %p44_p10 = scmp.ne.s32.totalorder %s885_s25, %s881_s24  ;;  %p194_p13 = scmp.eq.s32.totalorder %s963_s8, 1 }
  0x18   : > { %s993_s23 = scalar_select %p29_p7, %s889_s26, %s31_s22  }
  0x19   : > { %p995_p11 = por %p39_p9, %p38_p8  ;;  %p1001_p12 = por %p45_p1, %p44_p10 }
  0x1a   : > { %p200_p0 = scmp.eq.s32.totalorder %s591_s19, 1  ;;  %p687_p2 = scmp.lt.s32.totalorder %s893_s27, 2 }
  0x1b   : > { %s260_s30 = sand.u32 1, %s889_s26   ;;  %p1008_p4 = por %p194_p13, %p38_p8 }
  0x1c   : > { %p1012_p6 = por %p200_p0, %p44_p10  ;;  %s596_s12 = sshll.u32 %s260_s30, 3 }
  0x1d   : > { %s597_s13 = sshll.u32 %s893_s27, 3  ;;  %s264_s17 = scalar_lea.vmem [#allocation2], %s596_s12 }
  0x1e   : > { %s268_s16 = scalar_lea.hbm %s1100_s0, %s597_s13  ;;  %s272_s18 = sshll.u32 %s264_s17, 4  ;;  %s273_s18 = int_to_ptr.vmem [resolvable:$true] %s272_s18 }
  0x1f   : > { %s270_s21 = sshll.u32 %s268_s16, 4  ;;  %p1022_p7 = pnand %p687_p2, %p995_p11  ;;  %s271_s21 = int_to_ptr.hbm [resolvable:$true] %s270_s21 }
  0x20   : > { %s261_s22 = scalar_lea.sflag [#allocation3], %s260_s30  ;;  %s793_s1 = sshra.s32 %s271_s21, 4  ;;  %s794_s1 = int_to_ptr.hbm [resolvable:$true] %s793_s1 }
  0x21   : > { %s795_s3 = scalar_lea.hbm %s794_s1, 8  ;;  %p797_p9 = pneg %p1022_p7 }
  0x22   : > { %p796_p8 = scmp.ne.s32.totalorder %s794_s1, %s795_s3  ;;  %s800_s14 = scalar_lea.hbm %s1100_s0, 16 }
  0x23   : > { %p801_p11 = scmp.lt.s32.totalorder %s794_s1, %s1100_s0  ;;  %p802_p0 = scmp.lt.s32.totalorder %s800_s14, %s795_s3 }
  0x24   : > { %p798_p10 = pnand %p797_p9, %p796_p8 }
  0x25   : > { %p803_p2 = por %p802_p0, %p801_p11 }
  0x26   : > { %p799_p13 = pneg %p798_p10 }
  0x28   : > { %p804_p5 = pnand %p803_p2, %p799_p13 }
  0x2a   : > { %807 = shalt.err (!%p804_p5)
}
  0x2b   : > { %680 = dma.hbm_to_vmem [thread:$0]  (!%p1022_p7), %s271_s21, 128, %s273_s18, %s261_s22  }
  0x2c   : > { %281 = sbr.rel (%p968_p3) target bundleno = 588 (0x24c), region = 48  ;;  %s1039_s30 = sand.u32 (!%p968_p3), 1, %s885_s25  }
  0x2d   : > { %s599_s16 = sshll.u32 (!%p968_p3), %s1039_s30, 3  ;;  %s284_s17 = scalar_lea.sflag (!%p968_p3), [#allocation3], %s1039_s30 }
  0x2e   : > { %s287_s1 = scalar_lea.vmem (!%p968_p3), [#allocation2], %s599_s16 }
  0x31   : > { %868 = dma.done.wait (%p1001_p12), %s284_s17, 128  }
  0x32   : > { %870 = vsyncadd (%p1001_p12), %s284_s17, 4294967168 }
  0x33   : > { %872 = dma.done.wait (%p45_p1), [#allocation6], 1280  }
  0x34   : > { %874 = vsyncadd (%p45_p1), [#allocation6], 4294966016  ;;  %v649_v0 = vld [vmem:[#allocation5 + $0x8] sm:$0xff]  ;;  %v648_v2 = vld [vmem:[#allocation5] sm:$0xff]  ;;  %vm352_vm0 = vcmask 261120   ;;  %v455_v21 = vlaneseq  ;;  %s645_s21 = sshll.u32 %s963_s8, 3 }
  0x35   : > { %v657_v1 = vld [vmem:[#allocation7 + $0x38] sm:$0xff]  ;;  %362 = vmatpush.bf16.msra.mxu0 %v649_v0  ;;  %v330_v3 = vld [vmem:[%s287_s1] sm:$0xff]  ;;  %v656_v4 = vld [vmem:[#allocation7 + $0x30] sm:$0xff]  ;;  %s497_s14 = scalar_lea.hbm %s1107_s7, %s645_s21  ;;  %s328_s8 = scalar_lea.vmem [#allocation8], %s599_s16 }
  0x36   : > { %438 = vmatpush.bf16.msra.mxu1 %v657_v1  ;;  %v331_v5 = vpack.c.bf16 %v330_v3, %v330_v3  ;;  %v655_v6 = vld [vmem:[#allocation7 + $0x28] sm:$0xff]  ;;  %v654_v7 = vld [vmem:[#allocation7 + $0x20] sm:$0xff]  ;;  %v653_v8 = vld [vmem:[#allocation7 + $0x18] sm:$0xff]  ;;  %v456_v22 = vand.u32 127, %v455_v21  ;;  %s499_s17 = sshll.u32 %s328_s8, 4  ;;  %s501_s1 = sshll.u32 %s497_s14, 4  ;;  %s500_s17 = int_to_ptr.vmem [resolvable:$true] %s499_s17  ;;  %s502_s1 = int_to_ptr.hbm [resolvable:$true] %s501_s1 }
  0x37   : > { %v652_v9 = vld [vmem:[#allocation7 + $0x10] sm:$0xff]  ;;  %v651_v10 = vld [vmem:[#allocation7 + $0x8] sm:$0xff]  ;;  %v650_v11 = vld [vmem:[#allocation7] sm:$0xff]  ;;  %s487_s3 = scalar_lea.sflag [#allocation4], %s1039_s30  ;;  %s837_s9 = sshra.s32 %s502_s1, 4  ;;  %s838_s9 = int_to_ptr.hbm [resolvable:$true] %s837_s9 }
  0x38   : > { %v727_v12 = vld [vmem:[%s1102_s2] ss:$0 sm:$0xff]  ;;  %vm457_vm1 = vcmp.lt.s32.totalorder %v456_v22, 32  ;;  %s839_s29 = scalar_lea.hbm %s838_s9, 8  ;;  %s843_s19 = scalar_lea.hbm %s1107_s7, 16 }
  0x39   : > { %363 = vmatpush.bf16.msra.mxu0 %v648_v2  ;;  %v728_v17 = vld [vmem:[%s1104_s4] ss:$0 sm:$0xff]  ;;  %p840_p1 = scmp.ne.s32.totalorder %s838_s9, %s839_s29  ;;  %p844_p12 = scmp.lt.s32.totalorder %s838_s9, %s1107_s7 }
  0x3a   : > { %439 = vmatpush.bf16.msra.mxu1 %v656_v4  ;;  %v729_v37 = vld [vmem:[%s1105_s5] ss:$0 sm:$0xff]  ;;  %p845_p7 = scmp.lt.s32.totalorder %s843_s19, %s839_s29 }
  0x3b   : > { %v730_v40 = vld [vmem:[%s1106_s6] ss:$0 sm:$0xff]  ;;  %p841_p3 = pnand %p840_p1, %p1008_p4 }
  0x3c   : > { %611 = vmatmul.msk.bf16.vlgmr.msra.gmra.mxu0 %vm352_vm0, %v331_v5  ;;  %p846_p8 = por %p845_p7, %p844_p12 }
  0x3d   : > { %p842_p5 = pneg %p841_p3 }
  0x3e   : > { %440 = vmatpush.bf16.msra.mxu1 %v655_v6 }
  0x3f   : > { %p847_p9 = pnand %p846_p8, %p842_p5 }
  0x42   : > { %441 = vmatpush.bf16.msra.mxu1 %v654_v7 }
  0x46   : > { %442 = vmatpush.bf16.msra.mxu1 %v653_v8 }
  0x4a   : > { %443 = vmatpush.bf16.msra.mxu1 %v652_v9 }
  0x4e   : > { %444 = vmatpush.bf16.msra.mxu1 %v651_v10 }
  0x52   : > { %445 = vmatpush.bf16.msra.mxu1 %v650_v11 }
  0xb9   : > { %v365_v13 = vpop.f32.mrf.mxu0 }
  0xba   : > { %v366_v14 = vadd.f32 %v727_v12, %v365_v13 }
  0xbc   : > { %v369_v15 = vpack.c.bf16 %v366_v14, %v366_v14 }
  0xbe   : > { %446 = vmatmul.bf16.vlgmr.msra.gmra.mxu1 %v369_v15 }
  0xc1   : > { %v367_v16 = vpop.f32.mrf.mxu0 }
 0x13b   : > { %v447_v18 = vpop.f32.mrf.mxu1 }
 0x13c   : > { %v448_v19 = vadd.f32 %v728_v17, %v447_v18 }
 0x13e   : > { %451 = vadd.xlane.f32.xlu0 %v448_v19 }
 0x143   : > { %v449_v20 = vpop.f32.mrf.mxu1 }
 0x1b1   : > { %v452_v23 = vpop.xlane.xlu0 %451 }
 0x1b2   : > { %v453_v24 = vmul.f32 0.03125, %v452_v23 }
 0x1b4   : > { %v454_v25 = vsub.f32 %v448_v19, %v453_v24 }
 0x1b6   : > { %v458_v26 = vsel %vm457_vm1, %v454_v25, 0.0 }
 0x1b7   : > { %v459_v27 = vmul.f32 %v458_v26, %v458_v26 }
 0x1b9   : > { %460 = vadd.xlane.f32.xlu0 %v459_v27 }
 0x22c   : > { %v461_v28 = vpop.xlane.xlu0 %460 }
 0x22d   : > { %v462_v29 = vmul.f32 0.03125, %v461_v28 }
 0x22f   : > { %v463_v30 = vadd.f32 1e-05, %v462_v29 }
 0x231   : > { %731 = vrsqrt.f32 %v463_v30  ;;  %vm470_vm3 = vweird.f32 %v463_v30 }
 0x237   : > { %v732_v31 = vpop.eup %731 }
 0x238   : > { %v465_v32 = vmul.f32 %v732_v31, %v463_v30  ;;  %vm471_vm2 = vweird.f32 %v732_v31 }
 0x239   : > { %vm472_vm4 = vmor %vm470_vm3, %vm471_vm2 }
 0x23a   : > { %v466_v33 = vmul.f32 %v732_v31, %v465_v32 }
 0x23c   : > { %v467_v34 = vmul.f32 0.5, %v466_v33 }
 0x23e   : > { %v468_v35 = vsub.f32 1.5, %v467_v34 }
 0x240   : > { %v469_v36 = vmul.f32 %v732_v31, %v468_v35 }
 0x242   : > { %v473_v38 = vsel %vm472_vm4, %v732_v31, %v469_v36 }
 0x243   : > { %v474_v39 = vmul.f32 %v473_v38, %v458_v26 }
 0x245   : > { %v479_v41 = vmul.f32 %v729_v37, %v474_v39 }
 0x247   : > { %v484_v42 = vadd.f32 %v730_v40, %v479_v41 }
 0x249   : > { %485 = vst [vmem:[%s328_s8] sm:$0xff] %v484_v42 }
 0x24a   : > { %850 = shalt.err (!%p847_p9)
}
 0x24b   : > { %668 = dma.vmem_to_hbm [thread:$0]  (%p1008_p4), %s500_s17, 128, %s502_s1, %s487_s3  }
 0x24c PF: > { %s513_s30 = sand.u32 1, %s881_s24   ;;  %p1118_p10 = scmp.ge.s32.totalorder %s893_s27, 2 }
 0x24d   : > { %s514_s12 = scalar_lea.sflag [#allocation4], %s513_s30 }
 0x24e   : > { %p682_p13 = pnand %p1118_p10, %p1012_p6 }
 0x250   : > { %p683_p11 = pneg %p682_p13 }
 0x252   : > { %876 = dma.done.wait (%p683_p11), %s514_s12, 128  }
 0x253   : > { %878 = vsyncadd (%p683_p11), %s514_s12, 4294967168  ;;  %p21_p0 = scmp.ge.s32.totalorder %s982_s20, 4   ;;  %s1119_s24 = smov %s885_s25 }
 0x254   : > { %s1120_s25 = smov %s889_s26  ;;  %s1121_s26 = smov %s993_s23 }
 0x255   : > { %s1122_s27 = smov %s982_s20  ;;  %23 = sbr.rel (!%p21_p0) target bundleno = 9 (0x9), region = 101 }
 0x25a   :  { %520 = vsyncpa [#allocation3], 1 }
 0x25b   :  { %522 = vsyncpa [#allocation3 + $0x1], 1 }
 0x25c   :  { %523 = vsyncpa [#allocation6], 1 }
 0x25d   :  { %524 = vsyncpa [#allocation4], 1 }
 0x25e   :  { %526 = vsyncpa [#allocation4 + $0x1], 1 }

// kernel: tpu_custom_call.1
= control target key start
LH: loop header
LB: loop body
LE: loop exit
PB: predicated region body
PF: predicated region fallthrough
CT: control target
= control target key end

     0   :  { %s1100_s0 = inlined_call_operand.hbm [shape: f32[16,32], index: 0, kind: input, shape index: {}]   ;;  %s1101_s1 = inlined_call_operand.hbm [shape: bf16[32,128], index: 1, kind: input, shape index: {}]   ;;  %s1102_s2 = inlined_call_operand.vmem [shape: f32[1,128], index: 2, kind: input, shape index: {}]   ;;  %s1103_s3 = inlined_call_operand.hbm [shape: bf16[128,128], index: 3, kind: input, shape index: {}]   ;;  %s1104_s4 = inlined_call_operand.vmem [shape: f32[1,128], index: 4, kind: input, shape index: {}]   ;;  %s1105_s5 = inlined_call_operand.vmem [shape: f32[1,128], index: 5, kind: input, shape index: {}]   ;;  %s1106_s6 = inlined_call_operand.vmem [shape: f32[1,128], index: 6, kind: input, shape index: {}]   ;;  %s1107_s7 = inlined_call_operand.hbm [shape: f32[16,128], index: 7, kind: output, shape index: {}]  }
   0x1   :  { %1108 = sst [smem:[#allocation12_spill]] %s1101_s1 }
   0x2   :  { %1109 = sst [smem:[#allocation13_spill]] %s1103_s3 }
   0x3   :  { %12 = vsyncpa [#allocation3], 0 }
   0x4   :  { %14 = vsyncpa [#allocation3 + $0x1], 0 }
   0x5   :  { %15 = vsyncpa [#allocation6], 0 }
   0x6   :  { %16 = vsyncpa [#allocation4], 0 }
   0x7   :  { %18 = vsyncpa [#allocation4 + $0x1], 0  ;;  %s939_s24 = smov 0   ;;  %s941_s25 = smov 0  }
   0x8   :  { %s943_s26 = smov 0   ;;  %s945_s27 = smov 0  }
   0x9 LB: > { %s1110_s1 = sld [smem:[#allocation12_spill]]  ;;  %s963_s8 = sadd.s32 4294967295, %s893_s27   ;;  %s893_s27 = sphi %s945_s27, %s1122_s27   ;;  %s889_s26 = sphi %s943_s26, %s1121_s26   ;;  %s885_s25 = sphi %s941_s25, %s1120_s25   ;;  %s881_s24 = sphi %s939_s24, %s1119_s24  }
   0xa   : > { %p592_p0 = scmp.ge.s32.totalorder %s893_s27, 1  ;;  %p45_p1 = scmp.eq.s32.totalorder %s963_s8, 0 }
   0xb   : > { %p207_p2 = scmp.lt.s32.totalorder %s893_s27, 3  ;;  %s895_s10 = smov [#allocation5]  }
   0xc   : > { %s220_s11 = sshll.u32 %s895_s10, 4  ;;  %s1112_s3 = sld [smem:[#allocation13_spill]]  ;;  %s221_s11 = int_to_ptr.vmem [resolvable:$true] %s220_s11 }
   0xd   : > { %p968_p3 = pnand %p592_p0, %p207_p2  ;;  %s896_s15 = smov [#allocation7]  }
   0xe   : > { %s237_s16 = sshll.u32 %s896_s15, 4  ;;  %s897_s17 = smov 64   ;;  %s238_s16 = int_to_ptr.vmem [resolvable:$true] %s237_s16 }
   0xf   : > { %s218_s30 = sshll.u32 %s1110_s1, 4  ;;  %p670_p4 = pneg %p968_p3  ;;  %s219_s30 = int_to_ptr.hbm [resolvable:$true] %s218_s30 }
  0x10   : > { %s898_s18 = smov 4   ;;  %s591_s19 = sadd.s32 4294967294, %s893_s27  }
  0x11   : > { %p671_p6 = pnand %p670_p4, %p45_p1  ;;  %s982_s20 = sadd.s32 1, %s893_s27  }
  0x12   : > { %s235_s14 = sshll.u32 %s1112_s3, 4  ;;  %s28_s21 = ssub.s32 %s893_s27, %s982_s20  ;;  %s236_s14 = int_to_ptr.hbm [resolvable:$true] %s235_s14 }
  0x13   : > { %673 = dma.hbm_to_vmem [thread:$0]  (!%p671_p6), %s219_s30, 256, %s221_s11, [#allocation6], %s897_s17, %s897_s17, %s898_s18  }
  0x14   : > { %676 = dma.hbm_to_vmem [thread:$0]  (!%p671_p6), %s236_s14, 1024, %s238_s16, [#allocation6], %s897_s17, %s897_s17, %s898_s18  }
  0x15   : > { %s31_s22 = sadd.s32 1, %s889_s26  ;;  %p29_p7 = scmp.eq.s32.totalorder %s28_s21, 0 }
  0x16   : > { %p38_p8 = scmp.ne.s32.totalorder %s889_s26, %s885_s25  ;;  %p39_p9 = scmp.eq.s32.totalorder %s893_s27, 0 }
  0x17   : > { %p44_p10 = scmp.ne.s32.totalorder %s885_s25, %s881_s24  ;;  %p194_p13 = scmp.eq.s32.totalorder %s963_s8, 1 }
  0x18   : > { %s993_s23 = scalar_select %p29_p7, %s889_s26, %s31_s22  }
  0x19   : > { %p995_p11 = por %p39_p9, %p38_p8  ;;  %p1001_p12 = por %p45_p1, %p44_p10 }
  0x1a   : > { %p200_p0 = scmp.eq.s32.totalorder %s591_s19, 1  ;;  %p687_p2 = scmp.lt.s32.totalorder %s893_s27, 2 }
  0x1b   : > { %s260_s30 = sand.u32 1, %s889_s26   ;;  %p1008_p4 = por %p194_p13, %p38_p8 }
  0x1c   : > { %p1012_p6 = por %p200_p0, %p44_p10  ;;  %s596_s12 = sshll.u32 %s260_s30, 3 }
  0x1d   : > { %s597_s13 = sshll.u32 %s893_s27, 3  ;;  %s264_s17 = scalar_lea.vmem [#allocation2], %s596_s12 }
  0x1e   : > { %s268_s16 = scalar_lea.hbm %s1100_s0, %s597_s13  ;;  %s272_s18 = sshll.u32 %s264_s17, 4  ;;  %s273_s18 = int_to_ptr.vmem [resolvable:$true] %s272_s18 }
  0x1f   : > { %s270_s21 = sshll.u32 %s268_s16, 4  ;;  %p1022_p7 = pnand %p687_p2, %p995_p11  ;;  %s271_s21 = int_to_ptr.hbm [resolvable:$true] %s270_s21 }
  0x20   : > { %s261_s22 = scalar_lea.sflag [#allocation3], %s260_s30  ;;  %s793_s1 = sshra.s32 %s271_s21, 4  ;;  %s794_s1 = int_to_ptr.hbm [resolvable:$true] %s793_s1 }
  0x21   : > { %s795_s3 = scalar_lea.hbm %s794_s1, 8  ;;  %p797_p9 = pneg %p1022_p7 }
  0x22   : > { %p796_p8 = scmp.ne.s32.totalorder %s794_s1, %s795_s3  ;;  %s800_s14 = scalar_lea.hbm %s1100_s0, 16 }
  0x23   : > { %p801_p11 = scmp.lt.s32.totalorder %s794_s1, %s1100_s0  ;;  %p802_p0 = scmp.lt.s32.totalorder %s800_s14, %s795_s3 }
  0x24   : > { %p798_p10 = pnand %p797_p9, %p796_p8 }
  0x25   : > { %p803_p2 = por %p802_p0, %p801_p11 }
  0x26   : > { %p799_p13 = pneg %p798_p10 }
  0x28   : > { %p804_p5 = pnand %p803_p2, %p799_p13 }
  0x2a   : > { %807 = shalt.err (!%p804_p5)
}
  0x2b   : > { %680 = dma.hbm_to_vmem [thread:$0]  (!%p1022_p7), %s271_s21, 128, %s273_s18, %s261_s22  }
  0x2c   : > { %281 = sbr.rel (%p968_p3) target bundleno = 588 (0x24c), region = 48  ;;  %s1039_s30 = sand.u32 (!%p968_p3), 1, %s885_s25  }
  0x2d   : > { %s599_s16 = sshll.u32 (!%p968_p3), %s1039_s30, 3  ;;  %s284_s17 = scalar_lea.sflag (!%p968_p3), [#allocation3], %s1039_s30 }
  0x2e   : > { %s287_s1 = scalar_lea.vmem (!%p968_p3), [#allocation2], %s599_s16 }
  0x31   : > { %868 = dma.done.wait (%p1001_p12), %s284_s17, 128  }
  0x32   : > { %870 = vsyncadd (%p1001_p12), %s284_s17, 4294967168 }
  0x33   : > { %872 = dma.done.wait (%p45_p1), [#allocation6], 1280  }
  0x34   : > { %874 = vsyncadd (%p45_p1), [#allocation6], 4294966016  ;;  %v649_v0 = vld [vmem:[#allocation5 + $0x8] sm:$0xff]  ;;  %v648_v2 = vld [vmem:[#allocation5] sm:$0xff]  ;;  %vm352_vm0 = vcmask 261120   ;;  %v455_v21 = vlaneseq  ;;  %s645_s21 = sshll.u32 %s963_s8, 3 }
  0x35   : > { %v657_v1 = vld [vmem:[#allocation7 + $0x38] sm:$0xff]  ;;  %362 = vmatpush.bf16.msra.mxu0 %v649_v0  ;;  %v330_v3 = vld [vmem:[%s287_s1] sm:$0xff]  ;;  %v656_v4 = vld [vmem:[#allocation7 + $0x30] sm:$0xff]  ;;  %s497_s14 = scalar_lea.hbm %s1107_s7, %s645_s21  ;;  %s328_s8 = scalar_lea.vmem [#allocation8], %s599_s16 }
  0x36   : > { %438 = vmatpush.bf16.msra.mxu1 %v657_v1  ;;  %v331_v5 = vpack.c.bf16 %v330_v3, %v330_v3  ;;  %v655_v6 = vld [vmem:[#allocation7 + $0x28] sm:$0xff]  ;;  %v654_v7 = vld [vmem:[#allocation7 + $0x20] sm:$0xff]  ;;  %v653_v8 = vld [vmem:[#allocation7 + $0x18] sm:$0xff]  ;;  %v456_v22 = vand.u32 127, %v455_v21  ;;  %s499_s17 = sshll.u32 %s328_s8, 4  ;;  %s501_s1 = sshll.u32 %s497_s14, 4  ;;  %s500_s17 = int_to_ptr.vmem [resolvable:$true] %s499_s17  ;;  %s502_s1 = int_to_ptr.hbm [resolvable:$true] %s501_s1 }
  0x37   : > { %v652_v9 = vld [vmem:[#allocation7 + $0x10] sm:$0xff]  ;;  %v651_v10 = vld [vmem:[#allocation7 + $0x8] sm:$0xff]  ;;  %v650_v11 = vld [vmem:[#allocation7] sm:$0xff]  ;;  %s487_s3 = scalar_lea.sflag [#allocation4], %s1039_s30  ;;  %s837_s9 = sshra.s32 %s502_s1, 4  ;;  %s838_s9 = int_to_ptr.hbm [resolvable:$true] %s837_s9 }
  0x38   : > { %v727_v12 = vld [vmem:[%s1102_s2] ss:$0 sm:$0xff]  ;;  %vm457_vm1 = vcmp.lt.s32.totalorder %v456_v22, 32  ;;  %s839_s29 = scalar_lea.hbm %s838_s9, 8  ;;  %s843_s19 = scalar_lea.hbm %s1107_s7, 16 }
  0x39   : > { %363 = vmatpush.bf16.msra.mxu0 %v648_v2  ;;  %v728_v17 = vld [vmem:[%s1104_s4] ss:$0 sm:$0xff]  ;;  %p840_p1 = scmp.ne.s32.totalorder %s838_s9, %s839_s29  ;;  %p844_p12 = scmp.lt.s32.totalorder %s838_s9, %s1107_s7 }
  0x3a   : > { %439 = vmatpush.bf16.msra.mxu1 %v656_v4  ;;  %v729_v37 = vld [vmem:[%s1105_s5] ss:$0 sm:$0xff]  ;;  %p845_p7 = scmp.lt.s32.totalorder %s843_s19, %s839_s29 }
  0x3b   : > { %v730_v40 = vld [vmem:[%s1106_s6] ss:$0 sm:$0xff]  ;;  %p841_p3 = pnand %p840_p1, %p1008_p4 }
  0x3c   : > { %611 = vmatmul.msk.bf16.vlgmr.msra.gmra.mxu0 %vm352_vm0, %v331_v5  ;;  %p846_p8 = por %p845_p7, %p844_p12 }
  0x3d   : > { %p842_p5 = pneg %p841_p3 }
  0x3e   : > { %440 = vmatpush.bf16.msra.mxu1 %v655_v6 }
  0x3f   : > { %p847_p9 = pnand %p846_p8, %p842_p5 }
  0x42   : > { %441 = vmatpush.bf16.msra.mxu1 %v654_v7 }
  0x46   : > { %442 = vmatpush.bf16.msra.mxu1 %v653_v8 }
  0x4a   : > { %443 = vmatpush.bf16.msra.mxu1 %v652_v9 }
  0x4e   : > { %444 = vmatpush.bf16.msra.mxu1 %v651_v10 }
  0x52   : > { %445 = vmatpush.bf16.msra.mxu1 %v650_v11 }
  0xb9   : > { %v365_v13 = vpop.f32.mrf.mxu0 }
  0xba   : > { %v366_v14 = vadd.f32 %v727_v12, %v365_v13 }
  0xbc   : > { %v369_v15 = vpack.c.bf16 %v366_v14, %v366_v14 }
  0xbe   : > { %446 = vmatmul.bf16.vlgmr.msra.gmra.mxu1 %v369_v15 }
  0xc1   : > { %v367_v16 = vpop.f32.mrf.mxu0 }
 0x13b   : > { %v447_v18 = vpop.f32.mrf.mxu1 }
 0x13c   : > { %v448_v19 = vadd.f32 %v728_v17, %v447_v18 }
 0x13e   : > { %451 = vadd.xlane.f32.xlu0 %v448_v19 }
 0x143   : > { %v449_v20 = vpop.f32.mrf.mxu1 }
 0x1b1   : > { %v452_v23 = vpop.xlane.xlu0 %451 }
 0x1b2   : > { %v453_v24 = vmul.f32 0.03125, %v452_v23 }
 0x1b4   : > { %v454_v25 = vsub.f32 %v448_v19, %v453_v24 }
 0x1b6   : > { %v458_v26 = vsel %vm457_vm1, %v454_v25, 0.0 }
 0x1b7   : > { %v459_v27 = vmul.f32 %v458_v26, %v458_v26 }
 0x1b9   : > { %460 = vadd.xlane.f32.xlu0 %v459_v27 }
 0x22c   : > { %v461_v28 = vpop.xlane.xlu0 %460 }
 0x22d   : > { %v462_v29 = vmul.f32 0.03125, %v461_v28 }
 0x22f   : > { %v463_v30 = vadd.f32 1e-05, %v462_v29 }
 0x231   : > { %731 = vrsqrt.f32 %v463_v30  ;;  %vm470_vm3 = vweird.f32 %v463_v30 }
 0x237   : > { %v732_v31 = vpop.eup %731 }
 0x238   : > { %v465_v32 = vmul.f32 %v732_v31, %v463_v30  ;;  %vm471_vm2 = vweird.f32 %v732_v31 }
 0x239   : > { %vm472_vm4 = vmor %vm470_vm3, %vm471_vm2 }
 0x23a   : > { %v466_v33 = vmul.f32 %v732_v31, %v465_v32 }
 0x23c   : > { %v467_v34 = vmul.f32 0.5, %v466_v33 }
 0x23e   : > { %v468_v35 = vsub.f32 1.5, %v467_v34 }
 0x240   : > { %v469_v36 = vmul.f32 %v732_v31, %v468_v35 }
 0x242   : > { %v473_v38 = vsel %vm472_vm4, %v732_v31, %v469_v36 }
 0x243   : > { %v474_v39 = vmul.f32 %v473_v38, %v458_v26 }
 0x245   : > { %v479_v41 = vmul.f32 %v729_v37, %v474_v39 }
 0x247   : > { %v484_v42 = vadd.f32 %v730_v40, %v479_v41 }
 0x249   : > { %485 = vst [vmem:[%s328_s8] sm:$0xff] %v484_v42 }
 0x24a   : > { %850 = shalt.err (!%p847_p9)
}
 0x24b   : > { %668 = dma.vmem_to_hbm [thread:$0]  (%p1008_p4), %s500_s17, 128, %s502_s1, %s487_s3  }
 0x24c PF: > { %s513_s30 = sand.u32 1, %s881_s24   ;;  %p1118_p10 = scmp.ge.s32.totalorder %s893_s27, 2 }
 0x24d   : > { %s514_s12 = scalar_lea.sflag [#allocation4], %s513_s30 }
 0x24e   : > { %p682_p13 = pnand %p1118_p10, %p1012_p6 }
 0x250   : > { %p683_p11 = pneg %p682_p13 }
 0x252   : > { %876 = dma.done.wait (%p683_p11), %s514_s12, 128  }
 0x253   : > { %878 = vsyncadd (%p683_p11), %s514_s12, 4294967168  ;;  %p21_p0 = scmp.ge.s32.totalorder %s982_s20, 4   ;;  %s1119_s24 = smov %s885_s25 }
 0x254   : > { %s1120_s25 = smov %s889_s26  ;;  %s1121_s26 = smov %s993_s23 }
 0x255   : > { %s1122_s27 = smov %s982_s20  ;;  %23 = sbr.rel (!%p21_p0) target bundleno = 9 (0x9), region = 101 }
 0x25a   :  { %520 = vsyncpa [#allocation3], 1 }
 0x25b   :  { %522 = vsyncpa [#allocation3 + $0x1], 1 }
 0x25c   :  { %523 = vsyncpa [#allocation6], 1 }
 0x25d   :  { %524 = vsyncpa [#allocation4], 1 }
 0x25e   :  { %526 = vsyncpa [#allocation4 + $0x1], 1 }

</bundles_post_ra>
